<compile_context>
chip_gen: v7x
topology: tpu7x:2x2x1
jax: 0.10.0
libtpu: 0.0.40
codegen_flags: <defaults>
</compile_context>

<pallas_src>
import jax
import jax.numpy as jnp
from jax.experimental import pallas as pl
from jax.experimental.pallas import tpu as pltpu


def _quantize_kernel(x_ref, w_ref, w2_ref, xd_ref, idx_ref, loss_ref):
    """One (C, tT) slab of tokens vs. the full codebook.

    x_ref:    (C, tT)   token slab (time on lanes)
    w_ref:    (K, C)    full codebook (resident; same block every step)
    w2_ref:   (K, 1)    precomputed ||w_k||^2 (resident)
    xd_ref:   (C, tT)   dequantized tokens, NCT layout
    idx_ref:  (1, tT)   selected code indices (lane-dense)
    loss_ref: (1, tT)   per-token sum_d (x - x_d)^2 (lane-dense; reduced in wrapper)
    """
    x = x_ref[...].astype(jnp.float32)          # (C, tT)
    w = w_ref[...].astype(jnp.float32)          # (K, C)
    w2 = w2_ref[...]                            # (K, 1)
    K = w.shape[0]
    tT = x.shape[1]

    # Distance proxy: the per-token ||x||^2 term is a per-column constant, so it does
    # not affect the argmin over codes.  dist[k, t] = ||w_k||^2 - 2 <w_k, x_t>.
    xw = jax.lax.dot_general(w, x, (((1,), (0,)), ((), ())),
                             preferred_element_type=jnp.float32)   # (K, tT)
    dist = w2 - 2.0 * xw                                           # (K, tT)

    # gumbel_sample with temperature == 0 (or eval) -> plain argmin(dist) over codes.
    # TODO(synk): stochastic Gumbel sampling (training path, temperature > 0) not implemented.
    # argmin over the K (sublane) axis with first-index tie-break via min + select.
    dmin = jnp.min(dist, axis=0, keepdims=True)                    # (1, tT)
    k_iota = jax.lax.broadcasted_iota(jnp.int32, (K, tT), 0)
    idx = jnp.min(jnp.where(dist <= dmin, k_iota, K), axis=0)      # (tT,) int32

    # dequantize: one-hot matmul (MXU) -> (C, tT) directly in NCT layout.
    onehot = (k_iota == idx[None, :]).astype(jnp.float32)          # (K, tT)
    x_d = jax.lax.dot_general(w, onehot, (((0,), (0,)), ((), ())),
                              preferred_element_type=jnp.float32)  # (C, tT)

    # straight-through: forward value of x + (x_d - x).detach() is exactly x_d
    xd_ref[...] = x_d.astype(xd_ref.dtype)
    idx_ref[...] = idx[None, :]
    loss_ref[...] = jnp.sum((x - x_d) ** 2, axis=0, keepdims=True)


def quantize_ema_reset_forward(x_nct, codebook, *, tT=512):
    """Forward of QuantizeEMAReset (eval / temperature=0, need_transpose=True path).

    x_nct:    (N, code_dim, T) activations
    codebook: (nb_code, code_dim)
    Returns (x_d (N, code_dim, T), code_idx (N, T), commit_loss scalar), matching
    QuantizeEMAReset.forward(x, return_idx=True, temperature=0.0); project_in /
    project_out are nn.Identity in this config.
    """
    N, C, T = x_nct.shape
    K, D = codebook.shape
    assert C == D, "channel dim must equal code_dim (need_transpose path)"

    # Tile the time axis on lanes; pad T up and slice the remainder off afterwards.
    if T <= tT:
        tT = T                      # single tile; block == full dim satisfies layout rules
        T_pad = T
    else:
        assert tT % 128 == 0, "tT must be a multiple of 128 when tiling the time axis"
        T_pad = pl.cdiv(T, tT) * tT

    x_in = x_nct if T_pad == T else jnp.pad(x_nct, ((0, 0), (0, 0), (0, T_pad - T)))
    w2 = jnp.sum(codebook.astype(jnp.float32) ** 2, axis=-1, keepdims=True)   # (K, 1)

    grid = (N, T_pad // tT)

    xd, idx, loss_tok = pl.pallas_call(
        _quantize_kernel,
        out_shape=(
            jax.ShapeDtypeStruct((N, C, T_pad), x_nct.dtype),
            jax.ShapeDtypeStruct((N, 1, T_pad), jnp.int32),
            jax.ShapeDtypeStruct((N, 1, T_pad), jnp.float32),
        ),
        grid_spec=pltpu.PrefetchScalarGridSpec(
            num_scalar_prefetch=0,
            grid=grid,
            in_specs=[
                pl.BlockSpec((None, C, tT), lambda n, t: (n, 0, t)),   # x slab, lane-dense
                pl.BlockSpec((K, D), lambda n, t: (0, 0)),             # resident codebook
                pl.BlockSpec((K, 1), lambda n, t: (0, 0)),             # resident ||w||^2
            ],
            out_specs=[
                pl.BlockSpec((None, C, tT), lambda n, t: (n, 0, t)),   # x_d in NCT layout
                pl.BlockSpec((None, 1, tT), lambda n, t: (n, 0, t)),   # idx, lane-dense
                pl.BlockSpec((None, 1, tT), lambda n, t: (n, 0, t)),   # per-token sq. err
            ],
        ),
        compiler_params=pltpu.CompilerParams(
            dimension_semantics=("parallel", "parallel")),             # no shared accumulator
    )(x_in, codebook, w2)

    if T_pad != T:
        xd = xd[:, :, :T]
        idx = idx[:, :, :T]
        loss_tok = loss_tok[:, :, :T]

    commit_loss = jnp.sum(loss_tok) / jnp.float32(N * T * D)           # F.mse_loss (mean)
    code_idx = idx.reshape(N, T)
    return xd, code_idx, commit_loss


def _reference(x_nct, codebook):
    N, C, T = x_nct.shape
    x = jnp.transpose(x_nct, (0, 2, 1)).reshape(N * T, C)
    kw = codebook.T
    dist = (jnp.sum(x ** 2, -1, keepdims=True) - 2 * x @ kw
            + jnp.sum(kw ** 2, 0, keepdims=True))
    idx = jnp.argmin(dist, axis=-1)
    x_d = codebook[idx]
    loss = jnp.mean((x - x_d) ** 2)
    x_d = x_d.reshape(N, T, C).transpose(0, 2, 1)
    return x_d, idx.reshape(N, T), loss


if __name__ == "__main__":
    # config: codebook_size=64, codebook_dim=32, hidden_size=32 (no projection)
    N, code_dim, T = 2, 32, 8
    nb_code = 64

    key = jax.random.PRNGKey(0)
    kx, kw, kx2 = jax.random.split(key, 3)
    x = jax.random.normal(kx, (N, code_dim, T), dtype=jnp.float32)
    codebook = jax.random.normal(kw, (nb_code, code_dim), dtype=jnp.float32)

    x_d, code_idx, commit_loss = quantize_ema_reset_forward(x, codebook)
    jax.block_until_ready((x_d, code_idx, commit_loss))

    # sanity check vs. pure-JAX reference (single-tile path)
    rx_d, ridx, rloss = _reference(x, codebook)
    assert x_d.shape == (N, code_dim, T)
    assert code_idx.shape == (N, T)
    assert jnp.all(code_idx == ridx)
    assert jnp.allclose(x_d, rx_d, atol=1e-5)
    assert jnp.allclose(commit_loss, rloss, atol=1e-5)

    # exercise the tiled + padded path (T > tT, T not a multiple of the tile)
    T2 = 200
    x2 = jax.random.normal(kx2, (N, code_dim, T2), dtype=jnp.float32)
    x_d2, code_idx2, commit_loss2 = quantize_ema_reset_forward(x2, codebook, tT=128)
    jax.block_until_ready((x_d2, code_idx2, commit_loss2))
    rx_d2, ridx2, rloss2 = _reference(x2, codebook)
    assert jnp.all(code_idx2 == ridx2)
    assert jnp.allclose(x_d2, rx_d2, atol=1e-5)
    assert jnp.allclose(commit_loss2, rloss2, atol=1e-5)

    print("KERNEL_OK")
</pallas_src>

<mosaic_0001>
module attributes {stable_mosaic.version = 11 : i64} {
  func.func @_quantize_kernel(%arg0: i32, %arg1: i32, %arg2: memref<1x32x8xf32, #tpu.memory_space<vmem>>, %arg3: memref<64x32xf32, #tpu.memory_space<vmem>>, %arg4: memref<64x1xf32, #tpu.memory_space<vmem>>, %arg5: memref<1x32x8xf32, #tpu.memory_space<vmem>>, %arg6: memref<1x1x8xi32, #tpu.memory_space<vmem>>, %arg7: memref<1x1x8xf32, #tpu.memory_space<vmem>>) attributes {dimension_semantics = [#tpu.dimension_semantics<parallel>, #tpu.dimension_semantics<parallel>], iteration_bounds = array<i64: 2, 1>, scalar_prefetch = 0 : i64, scratch_operands = 0 : i64, tpu.core_type = #tpu.core_type<tc>, window_params = [{transform_indices = @transform_0, window_bounds = array<i64: 1, 32, 8>}, {pipeline_mode = #tpu.pipeline_mode<synchronous>, transform_indices = @transform_1, window_bounds = array<i64: 64, 32>}, {pipeline_mode = #tpu.pipeline_mode<synchronous>, transform_indices = @transform_2, window_bounds = array<i64: 64, 1>}, {transform_indices = @transform_3, window_bounds = array<i64: 1, 32, 8>}, {transform_indices = @transform_4, window_bounds = array<i64: 1, 1, 8>}, {transform_indices = @transform_5, window_bounds = array<i64: 1, 1, 8>}]} {
    %c0 = arith.constant 0 : index
    %c0_0 = arith.constant 0 : index
    %c0_1 = arith.constant 0 : index
    %0 = vector.load %arg2[%c0, %c0_0, %c0_1] : memref<1x32x8xf32, #tpu.memory_space<vmem>>, vector<1x32x8xf32>
    %1 = vector.shape_cast %0 : vector<1x32x8xf32> to vector<32x8xf32>
    %c0_2 = arith.constant 0 : index
    %c0_3 = arith.constant 0 : index
    %2 = vector.load %arg3[%c0_2, %c0_3] : memref<64x32xf32, #tpu.memory_space<vmem>>, vector<64x32xf32>
    %c0_4 = arith.constant 0 : index
    %c0_5 = arith.constant 0 : index
    %3 = vector.load %arg4[%c0_4, %c0_5] : memref<64x1xf32, #tpu.memory_space<vmem>>, vector<64x1xf32>
    %cst = arith.constant dense<0.000000e+00> : vector<64x8xf32>
    %4 = tpu.matmul %2, %1, %cst {dimension_numbers = #tpu.dot_dimension_numbers<[1], [0], [0], [1], [0, 0, 1, 1], [], []>} : vector<64x32xf32>, vector<32x8xf32>, vector<64x8xf32> -> vector<64x8xf32>
    %cst_6 = arith.constant 2.000000e+00 : f32
    %5 = vector.broadcast %cst_6 : f32 to vector<64x8xf32>
    %6 = arith.mulf %5, %4 : vector<64x8xf32>
    %7 = vector.broadcast %3 : vector<64x1xf32> to vector<64x8xf32>
    %8 = arith.subf %7, %6 : vector<64x8xf32>
    %cst_7 = arith.constant dense<0x7F800000> : vector<8xf32>
    %9 = vector.multi_reduction <minimumf>, %8, %cst_7 [0] : vector<64x8xf32> to vector<8xf32>
    %10 = vector.shape_cast %9 : vector<8xf32> to vector<1x8xf32>
    %11 = tpu.iota {dimensions = array<i32: 0>} : vector<64x8xi32>
    %12 = vector.broadcast %10 : vector<1x8xf32> to vector<64x8xf32>
    %13 = arith.cmpf ole, %8, %12 : vector<64x8xf32>
    %c64_i32 = arith.constant 64 : i32
    %14 = vector.broadcast %c64_i32 : i32 to vector<64x8xi32>
    %15 = arith.select %13, %11, %14 : vector<64x8xi1>, vector<64x8xi32>
    %cst_8 = arith.constant dense<2147483647> : vector<8xi32>
    %16 = vector.multi_reduction <minsi>, %15, %cst_8 [0] : vector<64x8xi32> to vector<8xi32>
    %17 = vector.shape_cast %16 : vector<8xi32> to vector<1x8xi32>
    %18 = vector.broadcast %17 : vector<1x8xi32> to vector<64x8xi32>
    %19 = arith.cmpi eq, %11, %18 : vector<64x8xi32>
    %20 = arith.extui %19 : vector<64x8xi1> to vector<64x8xi32>
    %21 = arith.sitofp %20 : vector<64x8xi32> to vector<64x8xf32>
    %cst_9 = arith.constant dense<0.000000e+00> : vector<32x8xf32>
    %22 = tpu.matmul %2, %21, %cst_9 {dimension_numbers = #tpu.dot_dimension_numbers<[0], [0], [1], [1], [0, 1, 1, 1], [], []>} : vector<64x32xf32>, vector<64x8xf32>, vector<32x8xf32> -> vector<32x8xf32>
    %c0_10 = arith.constant 0 : index
    %c0_11 = arith.constant 0 : index
    %c0_12 = arith.constant 0 : index
    %23 = vector.load %arg5[%c0_10, %c0_11, %c0_12] : memref<1x32x8xf32, #tpu.memory_space<vmem>>, vector<1x32x8xf32>
    %24 = vector.shape_cast %23 : vector<1x32x8xf32> to vector<32x8xf32>
    %25 = vector.shape_cast %22 : vector<32x8xf32> to vector<1x32x8xf32>
    tpu.vector_store %arg5[%c0_10, %c0_11, %c0_12], %25 {strides = array<i32>} : memref<1x32x8xf32, #tpu.memory_space<vmem>>, vector<1x32x8xf32>,
    %26 = vector.shape_cast %16 : vector<8xi32> to vector<1x8xi32>
    %c0_13 = arith.constant 0 : index
    %c0_14 = arith.constant 0 : index
    %c0_15 = arith.constant 0 : index
    %27 = vector.load %arg6[%c0_13, %c0_14, %c0_15] : memref<1x1x8xi32, #tpu.memory_space<vmem>>, vector<1x1x8xi32>
    %28 = vector.shape_cast %27 : vector<1x1x8xi32> to vector<1x8xi32>
    %29 = vector.shape_cast %26 : vector<1x8xi32> to vector<1x1x8xi32>
    tpu.vector_store %arg6[%c0_13, %c0_14, %c0_15], %29 {strides = array<i32>} : memref<1x1x8xi32, #tpu.memory_space<vmem>>, vector<1x1x8xi32>,
    %30 = arith.subf %1, %22 : vector<32x8xf32>
    %31 = arith.mulf %30, %30 : vector<32x8xf32>
    %cst_16 = arith.constant dense<0.000000e+00> : vector<8xf32>
    %32 = vector.multi_reduction <add>, %31, %cst_16 [0] : vector<32x8xf32> to vector<8xf32>
    %33 = vector.shape_cast %32 : vector<8xf32> to vector<1x8xf32>
    %c0_17 = arith.constant 0 : index
    %c0_18 = arith.constant 0 : index
    %c0_19 = arith.constant 0 : index
    %34 = vector.load %arg7[%c0_17, %c0_18, %c0_19] : memref<1x1x8xf32, #tpu.memory_space<vmem>>, vector<1x1x8xf32>
    %35 = vector.shape_cast %34 : vector<1x1x8xf32> to vector<1x8xf32>
    %36 = vector.shape_cast %33 : vector<1x8xf32> to vector<1x1x8xf32>
    tpu.vector_store %arg7[%c0_17, %c0_18, %c0_19], %36 {strides = array<i32>} : memref<1x1x8xf32, #tpu.memory_space<vmem>>, vector<1x1x8xf32>,
    return
  }
  func.func @transform_0(%arg0: i32, %arg1: i32) -> (i32, i32, i32) {
    %c0_i32 = arith.constant 0 : i32
    %c0_i32_0 = arith.constant 0 : i32
    return %arg0, %c0_i32, %arg1 : i32, i32, i32
  }
  func.func @transform_1(%arg0: i32, %arg1: i32) -> (i32, i32) {
    %c0_i32 = arith.constant 0 : i32
    %c0_i32_0 = arith.constant 0 : i32
    %c0_i32_1 = arith.constant 0 : i32
    return %c0_i32, %c0_i32_0 : i32, i32
  }
  func.func @transform_2(%arg0: i32, %arg1: i32) -> (i32, i32) {
    %c0_i32 = arith.constant 0 : i32
    %c0_i32_0 = arith.constant 0 : i32
    %c0_i32_1 = arith.constant 0 : i32
    return %c0_i32, %c0_i32_0 : i32, i32
  }
  func.func @transform_3(%arg0: i32, %arg1: i32) -> (i32, i32, i32) {
    %c0_i32 = arith.constant 0 : i32
    %c0_i32_0 = arith.constant 0 : i32
    return %arg0, %c0_i32, %arg1 : i32, i32, i32
  }
  func.func @transform_4(%arg0: i32, %arg1: i32) -> (i32, i32, i32) {
    %c0_i32 = arith.constant 0 : i32
    %c0_i32_0 = arith.constant 0 : i32
    return %arg0, %c0_i32, %arg1 : i32, i32, i32
  }
  func.func @transform_5(%arg0: i32, %arg1: i32) -> (i32, i32, i32) {
    %c0_i32 = arith.constant 0 : i32
    %c0_i32_0 = arith.constant 0 : i32
    return %arg0, %c0_i32, %arg1 : i32, i32, i32
  }
}

</mosaic_0001>

<bundles_post_ra>
// kernel: tpu_custom_call.1
= control target key start
LH: loop header
LB: loop body
LE: loop exit
PB: predicated region body
PF: predicated region fallthrough
CT: control target
= control target key end

     0   :  { %11 = vsyncpa [#allocation3], 0  ;;  %s1570_s0 = inlined_call_operand.vmem [shape: f32[2,32,8], index: 0, kind: input, shape index: {}]   ;;  %s1571_s1 = inlined_call_operand.vmem [shape: f32[64,32], index: 1, kind: input, shape index: {}]   ;;  %s1572_s2 = inlined_call_operand.vmem [shape: f32[64,1], index: 2, kind: input, shape index: {}]   ;;  %s1573_s3 = inlined_call_operand.vmem [shape: f32[2,32,8], index: 3, kind: output, shape index: {0}]   ;;  %s1574_s4 = inlined_call_operand.hbm [shape: s32[2,1,8], index: 4, kind: output, shape index: {1}]   ;;  %s1575_s5 = inlined_call_operand.hbm [shape: f32[2,1,8], index: 5, kind: output, shape index: {2}]  }
   0x1   :  { %13 = vsyncpa [#allocation3 + $0x1], 0 }
   0x2   :  { %14 = vsyncpa [#allocation5], 0 }
   0x3   :  { %16 = vsyncpa [#allocation5 + $0x1], 0  ;;  %s1267_s18 = smov 0   ;;  %s1269_s19 = smov 0  }
   0x4   :  { %s1271_s20 = smov 0   ;;  %s1273_s21 = smov 0  }
   0x5   :  { %s1275_s22 = smov 0   ;;  %s1277_s23 = smov 0  }
   0x6 LB: > { %s923_s24 = sadd.s32 4294967295, %s1231_s23   ;;  %s924_s25 = sadd.s32 4294967294, %s1231_s23   ;;  %s1231_s23 = sphi %s1277_s23, %s22_s23   ;;  %s1227_s22 = sphi %s1275_s22, %s1582_s22   ;;  %s1223_s21 = sphi %s1273_s21, %s1581_s21   ;;  %s1219_s20 = sphi %s1271_s20, %s1580_s20   ;;  %s1215_s19 = sphi %s1269_s19, %s1579_s19   ;;  %s1211_s18 = sphi %s1267_s18, %s1578_s18  }
   0x7   : > { %s34_s26 = sadd.s32 1, %s1227_s22  ;;  %s141_s27 = sadd.s32 1, %s1219_s20 }
   0x8   : > { %p36_p0 = scmp.ge.s32.totalorder %s34_s26, 2  ;;  %p151_p1 = scmp.ne.s32.totalorder %s1219_s20, %s1215_s19 }
   0x9   : > { %p152_p2 = scmp.eq.s32.totalorder %s923_s24, 1  ;;  %p157_p3 = scmp.ne.s32.totalorder %s1215_s19, %s1211_s18 }
   0xa   : > { %s1584_s26 = smov (%p36_p0, %s34_s26), 0  ;;  %p158_p5 = scmp.eq.s32.totalorder %s924_s25, 1 }
   0xb   : > { %p1307_p4 = por %p152_p2, %p151_p1  ;;  %s136_s29 = ssub.s32 %s1227_s22, %s1584_s26 }
   0xc   : > { %p927_p6 = scmp.ge.s32.totalorder %s1231_s23, 1  ;;  %p139_p7 = scmp.eq.s32.totalorder %s136_s29, 0 }
   0xd   : > { %p1314_p8 = por %p158_p5, %p157_p3  ;;  %p221_p9 = scmp.lt.s32.totalorder %s1231_s23, 3 }
   0xe   : > { %s1320_s6 = scalar_select %p139_p7, %s1219_s20, %s141_s27  }
   0xf   : > { %p222_p10 = pnand %p927_p6, %p221_p9 }
  0x10   : > { %p263_p11 = scmp.lt.s32.totalorder (!%p222_p10), %s1223_s21, 1  ;;  %v283_v0 = vld [vmem:[%s1571_s1] sm:$0xff] (!%p222_p10)  ;;  %vm299_vm0 = vcmask (!%p222_p10), 261120   ;;  %v1233_v1 = vmov (!%p222_p10), 0   ;;  %v293_v2 = vld [vmem:[%s1572_s2 + $0x10] sm:$0xff] (!%p222_p10)  ;;  %v294_v4 = vld [vmem:[%s1572_s2 + $0x18] sm:$0xff] (!%p222_p10) }
  0x11   : > { %225 = sbr.rel (%p222_p10) target bundleno = 583 (0x247), region = 32  ;;  %998 = vmatprep.mubr.msk.f32.mxu0 (!%p222_p10), %vm299_vm0, %v283_v0  ;;  %1120 = vset.pattern.permute.xlu1 (!%p222_p10), %v1233_v1  ;;  %v291_v3 = vld [vmem:[%s1572_s2] sm:$0xff] (!%p222_p10)  ;;  %v292_v5 = vld [vmem:[%s1572_s2 + $0x8] sm:$0xff] (!%p222_p10)  ;;  %v298_v14 = vld [vmem:[%s1572_s2 + $0x38] sm:$0xff] (!%p222_p10)  ;;  %vm619_vm1 = vcmask (!%p222_p10), 523264   ;;  %vm485_vm2 = vcmask (!%p222_p10), 64512  }
  0x12   : > { %1119 = vset.pattern.permute.xlu0 (!%p222_p10), %v1233_v1  ;;  %449 = vperm.xlu1 (!%p222_p10), %1120, %v293_v2   ;;  %v296_v12 = vld [vmem:[%s1572_s2 + $0x28] sm:$0xff] (!%p222_p10)  ;;  %v295_v13 = vld [vmem:[%s1572_s2 + $0x20] sm:$0xff] (!%p222_p10)  ;;  %v297_v15 = vld [vmem:[%s1572_s2 + $0x30] sm:$0xff] (!%p222_p10)  ;;  %s1458_s24 = sand.u32 (!%p222_p10), 1, %s1215_s19   ;;  %s960_s27 = sshll.u32 (!%p222_p10), %s1223_s21, 4 }
  0x13   : > { %439 = vperm.xlu0 (!%p222_p10), %1119, %v291_v3   ;;  %v284_v16 = vld [vmem:[%s1571_s1 + $0x8] sm:$0xff] (!%p222_p10)  ;;  %v285_v17 = vld [vmem:[%s1571_s1 + $0x10] sm:$0xff] (!%p222_p10)  ;;  %v286_v18 = vld [vmem:[%s1571_s1 + $0x18] sm:$0xff] (!%p222_p10)  ;;  %s1478_s8 = scalar_lea.hbm (!%p222_p10), %s1574_s4, %s960_s27  ;;  %s754_s11 = scalar_lea.sflag (!%p222_p10), [#allocation3], %s1458_s24 }
  0x14   : > { %v287_v19 = vld [vmem:[%s1571_s1 + $0x20] sm:$0xff] (!%p222_p10)  ;;  %v288_v20 = vld [vmem:[%s1571_s1 + $0x28] sm:$0xff] (!%p222_p10)  ;;  %v289_v21 = vld [vmem:[%s1571_s1 + $0x30] sm:$0xff] (!%p222_p10)  ;;  %s1235_s13 = smov (!%p222_p10), [#allocation2]  }
  0x15   : > { %v290_v22 = vld [vmem:[%s1571_s1 + $0x38] sm:$0xff] (!%p222_p10)  ;;  %s1125_s15 = sshll.u32 (!%p222_p10), %s1235_s13, 4  ;;  %s1126_s15 = int_to_ptr.vmem [resolvable:$false] %s1125_s15 }
  0x16   : > { %454 = vperm.xlu1 (!%p222_p10), %1120, %v294_v4   ;;  %s1127_s16 = scalar_lea.vmem (!%p222_p10), %s1126_s15, 32 }
  0x17   : > { %444 = vperm.xlu0 (!%p222_p10), %1119, %v292_v5  }
  0x18   : > { %s1328_s9 = scalar_select %p263_p11, %s1223_s21, 1 }
  0x1a   : > { %s964_s14 = sshll.u32 %s1328_s9, 5  ;;  %464 = vperm.xlu1 %1120, %v296_v12   ;;  %v507_v12 = vlaneseq }
  0x1b   : > { %s270_s25 = scalar_lea.vmem %s1570_s0, %s964_s14  ;;  %459 = vperm.xlu0 %1119, %v295_v13  }
  0x1c   : > { %v1348_v6 = vld [vmem:[%s270_s25] sm:$0xff]  ;;  %v1350_v7 = vld [vmem:[%s270_s25 + $0x8] sm:$0xff]  ;;  %v1352_v8 = vld [vmem:[%s270_s25 + $0x10] sm:$0xff] }
  0x1d   : > { %v1032_v9 = vpack.c.bf16 %v1350_v7, %v1348_v6  ;;  %v1356_v10 = vld [vmem:[%s270_s25 + $0x18] sm:$0xff]  ;;  %s256_s25 = scalar_lea.vmem [#allocation2], %s1458_s24 }
  0x1e   : > { %v1036_v11 = vpack.c.bf16 %v1356_v10, %v1352_v8  ;;  %474 = vperm.xlu1 %1120, %v298_v14   ;;  %s774_s10 = sshll.u32 %s256_s25, 4  ;;  %s775_s10 = int_to_ptr.vmem [resolvable:$true] %s774_s10 }
  0x1f   : > { %1033 = vmatprep.subr.bf16.mxu0 %v1032_v9  ;;  %469 = vperm.xlu0 %1119, %v297_v15   ;;  %v1418_v15 = vshrl.u32 %v507_v12, 7  ;;  %s1121_s12 = scalar_lea.vmem %s775_s10, 16  ;;  %p1128_p1 = scmp.lt.s32.totalorder %s775_s10, %s1126_s15 }
  0x20   : > { %1035 = vmatpush3.bf16.msra.mxu0 %v1032_v9  ;;  %p1122_p12 = scmp.ne.s32.totalorder %s775_s10, %s1121_s12  ;;  %p1129_p2 = scmp.lt.s32.totalorder %s1127_s16, %s1121_s12 }
  0x21   : > { %1037 = vmatprep.subr.bf16.mxu0 %v1036_v11 }
  0x22   : > { %p1123_p13 = pnand %p1122_p12, %p1307_p4  ;;  %p1130_p3 = por %p1129_p2, %p1128_p1 }
  0x24   : > { %1039 = vmatpush3.bf16.msra.mxu0 %v1036_v11  ;;  %p1124_p0 = pneg %p1123_p13 }
  0x26   : > { %p1131_p5 = pnand %p1130_p3, %p1124_p0 }
  0x27   : > { %999 = vmatmul.mubr.msk.f32.vlgmr.msra.gmra.mrb[0].mxu0 %vm299_vm0, %v284_v16 }
  0x28   : > { %1001 = vmatprep.mubr.msk.f32.mxu0 %vm299_vm0, %v285_v17 }
  0x2b   : > { %1002 = vmatmul.mubr.msk.f32.gmra.mrb[2].mxu0 %vm299_vm0, %v286_v18 }
  0x2c   : > { %1004 = vmatprep.mubr.msk.f32.mxu0 %vm299_vm0, %v287_v19 }
  0x2f   : > { %1005 = vmatmul.mubr.msk.f32.gmra.mrb[4].mxu0 %vm299_vm0, %v288_v20 }
  0x30   : > { %1007 = vmatprep.mubr.msk.f32.mxu0 %vm299_vm0, %v289_v21 }
  0x33   : > { %1008 = vmatmul.mubr.msk.f32.gmra.mrb[6].mxu0 %vm299_vm0, %v290_v22 }
  0x3d   : > { %587 = vxpose.xlu0.b32.start [1/8] (short) (narrow) %v283_v0, 32 }
  0x41   : > { %588 = vxpose.xlu0.b32.cont [2/8] (short) (narrow) %v284_v16, 32 }
  0x45   : > { %589 = vxpose.xlu0.b32.cont [3/8] (short) (narrow) %v285_v17, 32 }
  0x49   : > { %590 = vxpose.xlu0.b32.cont [4/8] (short) (narrow) %v286_v18, 32  ;;  %v1421_v18 = vadd.s32 16, %v1418_v15 }
  0x4d   : > { %591 = vxpose.xlu0.b32.cont [5/8] (short) (narrow) %v287_v19, 32  ;;  %v1424_v19 = vadd.s32 24, %v1418_v15 }
  0x51   : > { %592 = vxpose.xlu0.b32.cont [6/8] (short) (narrow) %v288_v20, 32  ;;  %v1427_v20 = vadd.s32 48, %v1418_v15 }
  0x55   : > { %593 = vxpose.xlu0.b32.cont [7/8] (short) (narrow) %v289_v21, 32  ;;  %v1430_v21 = vadd.s32 56, %v1418_v15 }
  0x59   : > { %594 = vxpose.xlu0.b32.end [8/8] (short) (narrow) %v290_v22, 32 }
  0x91   : > { %v450_v28 = vpop.permute.xlu1 %449 }
  0x92   : > { %v440_v23 = vpop.permute.xlu0 %439 }
  0x95   : > { %v455_v31 = vpop.permute.xlu1 %454 }
  0x96   : > { %v445_v24 = vpop.permute.xlu0 %444 }
  0x99   : > { %v465_v36 = vpop.permute.xlu1 %464 }
  0x9a   : > { %v460_v25 = vpop.permute.xlu0 %459 }
  0x9d   : > { %v475_v54 = vpop.permute.xlu1 %474 }
  0x9e   : > { %v470_v26 = vpop.permute.xlu0 %469 }
  0xbd   : > { %v603_v27 = vpop.trf.xlu0 }
  0xbe   : > { %1026 = vmatprep.mubr.msk.f32.mxu1 %vm619_vm1, %v603_v27 }
  0xfa   : > { %v1000_v29 = vpop.f32.mrb[0].mxu0 }
  0xfb   : > { %v390_v30 = vpop.f32.mrb[1].mxu0  ;;  %v430_v32 = vmul.f32 2.0, %v1000_v29 }
  0xfc   : > { %v429_v34 = vmul.f32 2.0, %v390_v30 }
  0xfd   : > { %v1401_v37 = vsub.f32 %v445_v24, %v430_v32  ;;  %v1434_v24 = vadd.s32 32, %v1418_v15 }
  0xfe   : > { %v1003_v33 = vpop.f32.mrb[2].mxu0  ;;  %v1403_v39 = vsub.f32 %v440_v23, %v429_v34  ;;  %v509_v23 = vadd.s32 8, %v1418_v15 }
  0xff   : > { %v400_v35 = vpop.f32.mrb[3].mxu0  ;;  %v432_v40 = vmul.f32 2.0, %v1003_v33  ;;  %v487_v46 = vsel %vm485_vm2, %v1401_v37, inf }
 0x100   : > { %v431_v43 = vmul.f32 2.0, %v400_v35  ;;  %v486_v49 = vsel %vm485_vm2, %v1403_v39, inf }
 0x101   : > { %v480_v50 = vsub.f32 %v455_v31, %v432_v40 }
 0x102   : > { %v1006_v38 = vpop.f32.mrb[4].mxu0  ;;  %v479_v55 = vsub.f32 %v450_v28, %v431_v43 }
 0x103   : > { %v434_v41 = vmul.f32 2.0, %v1006_v38  ;;  %v410_v42 = vpop.f32.mrb[5].mxu0  ;;  %v489_v62 = vsel %vm485_vm2, %v480_v50, inf }
 0x104   : > { %v433_v44 = vmul.f32 2.0, %v410_v42  ;;  %v488_v1 = vsel %vm485_vm2, %v479_v55, inf }
 0x105   : > { %v1405_v45 = vsub.f32 %v465_v36, %v434_v41 }
 0x106   : > { %v481_v47 = vsub.f32 %v460_v25, %v433_v44  ;;  %v1009_v48 = vpop.f32.mrb[6].mxu0  ;;  %v1437_v25 = vadd.s32 40, %v1418_v15 }
 0x107   : > { %v492_v51 = vsel %vm485_vm2, %v1405_v45, inf  ;;  %v436_v52 = vmul.f32 2.0, %v1009_v48  ;;  %v420_v53 = vpop.f32.mrb[7].mxu0 }
 0x108   : > { %v493_v56 = vmin.f32 %v487_v46, %v492_v51  ;;  %v490_v57 = vsel %vm485_vm2, %v481_v47, inf  ;;  %v435_v58 = vmul.f32 2.0, %v420_v53 }
 0x109   : > { %v491_v59 = vmin.f32 %v486_v49, %v490_v57  ;;  %v484_v60 = vsub.f32 %v475_v54, %v436_v52 }
 0x10a   : > { %v483_v61 = vsub.f32 %v470_v26, %v435_v58 }
 0x10b   : > { %v498_v63 = vmin.f32 %v491_v59, %v493_v56  ;;  %v496_v0 = vsel %vm485_vm2, %v484_v60, inf  ;;  %v604_v56 = vpop.trf.xlu0 }
 0x10c   : > { %v497_v2 = vmin.f32 %v489_v62, %v496_v0  ;;  %v494_v3 = vsel %vm485_vm2, %v483_v61, inf }
 0x10d   : > { %v495_v4 = vmin.f32 %v488_v1, %v494_v3 }
 0x10f   : > { %v499_v5 = vmin.f32 %v495_v4, %v497_v2  ;;  %v605_v57 = vpop.trf.xlu0 }
 0x111   : > { %v500_v9 = vmin.f32 %v498_v63, %v499_v5 }
 0x113   : > { %v501_v11 = vrot.slane %v500_v9, 4  ;;  %v606_v58 = vpop.trf.xlu0 }
 0x115   : > { %v502_v13 = vmin.f32 %v500_v9, %v501_v11 }
 0x117   : > { %v503_v14 = vrot.slane %v502_v13, 2 }
 0x119   : > { %v504_v16 = vmin.f32 %v502_v13, %v503_v14 }
 0x11b   : > { %v505_v17 = vrot.slane %v504_v16, 1 }
 0x11d   : > { %v506_v22 = vmin.f32 %v504_v16, %v505_v17 }
 0x11f   : > { %vm518_vm3 = vcmp.le.f32.partialorder %v479_v55, %v506_v22  ;;  %vm519_vm4 = vcmp.le.f32.partialorder %v480_v50, %v506_v22  ;;  %vm522_vm5 = vcmp.le.f32.partialorder %v483_v61, %v506_v22  ;;  %vm523_vm6 = vcmp.le.f32.partialorder %v484_v60, %v506_v22 }
 0x120   : > { %v526_v26 = vsel %vm518_vm3, %v1421_v18, 64  ;;  %v527_v27 = vsel %vm519_vm4, %v1424_v19, 64  ;;  %v530_v28 = vsel %vm522_vm5, %v1427_v20, 64  ;;  %v531_v29 = vsel %vm523_vm6, %v1430_v21, 64 }
 0x121   : > { %v534_v30 = vsel %vm485_vm2, %v526_v26, 2147483647  ;;  %v535_v31 = vsel %vm485_vm2, %v527_v27, 2147483647  ;;  %v542_v32 = vsel %vm485_vm2, %v530_v28, 2147483647  ;;  %vm516_vm7 = vcmp.le.f32.partialorder %v1403_v39, %v506_v22 }
 0x122   : > { %vm543_vm8 = vcmp.lt.s32.totalorder %v534_v30, %v542_v32  ;;  %v545_v33 = vsel %vm485_vm2, %v531_v29, 2147483647  ;;  %vm517_vm9 = vcmp.le.f32.partialorder %v1401_v37, %v506_v22  ;;  %vm520_vm10 = vcmp.le.f32.partialorder %v481_v47, %v506_v22 }
 0x123   : > { %v544_v34 = vsel %vm543_vm8, %v534_v30, %v542_v32  ;;  %vm546_vm11 = vcmp.lt.s32.totalorder %v535_v31, %v545_v33  ;;  %vm521_vm12 = vcmp.le.f32.partialorder %v1405_v45, %v506_v22  ;;  %v524_v35 = vsel %vm516_vm7, %v1418_v15, 64 }
 0x124   : > { %v547_v36 = vsel %vm546_vm11, %v535_v31, %v545_v33  ;;  %v525_v38 = vsel %vm517_vm9, %v509_v23, 64  ;;  %v528_v40 = vsel %vm520_vm10, %v1434_v24, 64  ;;  %v529_v41 = vsel %vm521_vm12, %v1437_v25, 64 }
 0x125   : > { %vm550_vm13 = vcmp.lt.s32.totalorder %v544_v34, %v547_v36  ;;  %v532_v39 = vsel %vm485_vm2, %v524_v35, 2147483647  ;;  %v533_v42 = vsel %vm485_vm2, %v525_v38, 2147483647  ;;  %v536_v37 = vsel %vm485_vm2, %v528_v40, 2147483647 }
 0x126   : > { %v551_v43 = vsel %vm550_vm13, %v544_v34, %v547_v36  ;;  %vm537_vm14 = vcmp.lt.s32.totalorder %v532_v39, %v536_v37  ;;  %v539_v44 = vsel %vm485_vm2, %v529_v41, 2147483647  ;;  %vm721_vm6 = vcmask 57344  }
 0x127   : > { %v538_v45 = vsel %vm537_vm14, %v532_v39, %v536_v37  ;;  %vm540_vm15 = vcmp.lt.s32.totalorder %v533_v42, %v539_v44  ;;  %v1234_v55 = vmov 1.0|1.0  }
 0x128   : > { %v541_v46 = vsel %vm540_vm15, %v533_v42, %v539_v44 }
 0x129   : > { %vm548_vm0 = vcmp.lt.s32.totalorder %v538_v45, %v541_v46 }
 0x12a   : > { %v549_v47 = vsel %vm548_vm0, %v538_v45, %v541_v46 }
 0x12b   : > { %vm552_vm3 = vcmp.lt.s32.totalorder %v549_v47, %v551_v43 }
 0x12c   : > { %v553_v48 = vsel %vm552_vm3, %v549_v47, %v551_v43 }
 0x12d   : > { %v554_v49 = vrot.slane %v553_v48, 4 }
 0x12f   : > { %vm555_vm4 = vcmp.lt.s32.totalorder %v553_v48, %v554_v49 }
 0x130   : > { %v556_v50 = vsel %vm555_vm4, %v553_v48, %v554_v49 }
 0x131   : > { %v557_v51 = vrot.slane %v556_v50, 2 }
 0x133   : > { %vm558_vm5 = vcmp.lt.s32.totalorder %v556_v50, %v557_v51 }
 0x134   : > { %v559_v52 = vsel %vm558_vm5, %v556_v50, %v557_v51 }
 0x135   : > { %v560_v53 = vrot.slane %v559_v52, 1 }
 0x137   : > { %vm561_vm7 = vcmp.lt.s32.totalorder %v559_v52, %v560_v53 }
 0x138   : > { %v562_v54 = vsel %vm561_vm7, %v559_v52, %v560_v53 }
 0x139   : > { %vm563_vm8 = vcmp.eq.s32.totalorder %v1418_v15, %v562_v54  ;;  %vm564_vm9 = vcmp.eq.s32.totalorder %v509_v23, %v562_v54  ;;  %vm565_vm10 = vcmp.eq.s32.totalorder %v1421_v18, %v562_v54  ;;  %vm566_vm11 = vcmp.eq.s32.totalorder %v1424_v19, %v562_v54  ;;  %722 = vst.msk [vmem:[%s256_s25] sm:$0x1] %vm721_vm6, %v562_v54 }
 0x13a   : > { %vm1040_vm12 = vmpackc.low %vm564_vm9, %vm563_vm8  ;;  %vm567_vm14 = vcmp.eq.s32.totalorder %v1434_v24, %v562_v54  ;;  %vm568_vm15 = vcmp.eq.s32.totalorder %v1437_v25, %v562_v54  ;;  %vm569_vm3 = vcmp.eq.s32.totalorder %v1427_v20, %v562_v54  ;;  %vm570_vm4 = vcmp.eq.s32.totalorder %v1430_v21, %v562_v54 }
 0x13b   : > { %1041 = vmatprep.subr.msk.bf16.mxu1 %vm1040_vm12, %v1234_v55  ;;  %vm1044_vm13 = vmpackc.low %vm566_vm11, %vm565_vm10 }
 0x13c   : > { %1043 = vmatpush3.bf16.msk.msra.mxu1 %vm1040_vm12, %v1234_v55  ;;  %vm1048_vm0 = vmpackc.low %vm568_vm15, %vm567_vm14 }
 0x13d   : > { %1045 = vmatprep.subr.msk.bf16.mxu1 %vm1044_vm13, %v1234_v55  ;;  %vm1052_vm5 = vmpackc.low %vm570_vm4, %vm569_vm3 }
 0x140   : > { %1047 = vmatpush3.bf16.msk.msra.mxu1 %vm1044_vm13, %v1234_v55 }
 0x141   : > { %1049 = vmatprep.subr.msk.bf16.mxu1 %vm1048_vm0, %v1234_v55 }
 0x144   : > { %1051 = vmatpush3.bf16.msk.msra.mxu1 %vm1048_vm0, %v1234_v55 }
 0x145   : > { %1053 = vmatprep.subr.msk.bf16.mxu1 %vm1052_vm5, %v1234_v55 }
 0x148   : > { %1055 = vmatpush3.bf16.msk.msra.mxu1 %vm1052_vm5, %v1234_v55 }
 0x14b   : > { %1027 = vmatmul.mubr.msk.f32.vlgmr.msra.gmra.mrb[0].mxu1 %vm619_vm1, %v604_v56 }
 0x14c   : > { %1029 = vmatprep.mubr.msk.f32.mxu1 %vm619_vm1, %v605_v57 }
 0x14f   : > { %1030 = vmatmul.mubr.msk.f32.gmra.mrb[2].mxu1 %vm619_vm1, %v606_v58 }
 0x150   : > { %1134 = shalt.err (!%p1131_p5)
}
 0x151   : > { %s1135_s17 = scalar_lea.hbm %s1478_s8, 16  ;;  %s1139_s7 = scalar_lea.hbm %s1574_s4, 32 }
 0x152   : > { %p1136_p6 = scmp.ne.s32.totalorder %s1478_s8, %s1135_s17  ;;  %p1140_p10 = scmp.lt.u32.totalorder %s1478_s8, %s1574_s4 }
 0x153   : > { %p1141_p11 = scmp.lt.u32.totalorder %s1139_s7, %s1135_s17  ;;  %p1143_p13 = scmp.lt.u32.totalorder %s1135_s17, %s1478_s8 }
 0x154   : > { %p1137_p7 = pnand %p1136_p6, %p1307_p4 }
 0x155   : > { %p1142_p12 = por %p1141_p11, %p1140_p10 }
 0x156   : > { %p1138_p9 = pneg %p1137_p7 }
 0x157   : > { %p1144_p0 = por %p1143_p13, %p1142_p12 }
 0x159   : > { %p1145_p1 = pnand %p1144_p0, %p1138_p9 }
 0x15b   : > { %1148 = shalt.err (!%p1145_p1)
}
 0x15c   : > { %1056 = dma.vmem_to_hbm [thread:$0]  (%p1307_p4), %s775_s10, 16, %s1478_s8, %s754_s11  }
 0x15d   : > { %s278_s25 = scalar_lea.vmem %s1573_s3, %s964_s14  ;;  %s262_s9 = scalar_lea.vmem [#allocation4], %s1458_s24 }
 0x15e   : > { %s788_s14 = sshll.u32 %s262_s9, 4  ;;  %s1521_s11 = scalar_lea.hbm %s1575_s5, %s960_s27  ;;  %s1523_s14 = int_to_ptr.vmem [resolvable:$true] %s788_s14 }
 0x15f   : > { %s758_s17 = scalar_lea.sflag [#allocation5], %s1458_s24  ;;  %s1149_s29 = scalar_lea.vmem %s1523_s14, 16 }
 0x160   : > { %p1150_p2 = scmp.ne.s32.totalorder %s1523_s14, %s1149_s29  ;;  %s1236_s7 = smov [#allocation4]  }
 0x161   : > { %s1153_s21 = sshll.u32 %s1236_s7, 4  ;;  %s1154_s21 = int_to_ptr.vmem [resolvable:$false] %s1153_s21 }
 0x162   : > { %p1151_p3 = pnand %p1150_p2, %p1307_p4  ;;  %s1155_s13 = scalar_lea.vmem %s1154_s21, 32 }
 0x163   : > { %p1156_p6 = scmp.lt.s32.totalorder %s1523_s14, %s1154_s21  ;;  %p1157_p7 = scmp.lt.s32.totalorder %s1155_s13, %s1149_s29 }
 0x164   : > { %p1152_p5 = pneg %p1151_p3 }
 0x165   : > { %p1158_p9 = por %p1157_p7, %p1156_p6 }
 0x167   : > { %p1159_p10 = pnand %p1158_p9, %p1152_p5 }
 0x21e   : > { %v1028_v59 = vpop.f32.mrb[0].mxu1 }
 0x21f   : > { %718 = vst.msk [vmem:[%s278_s25 + $0x8] sm:$0xff] %vm485_vm2, %v1028_v59  ;;  %v724_v60 = vsub.f32 %v1350_v7, %v1028_v59  ;;  %v698_v61 = vpop.f32.mrb[1].mxu1 }
 0x220   : > { %717 = vst.msk [vmem:[%s278_s25] sm:$0xff] %vm485_vm2, %v698_v61  ;;  %v723_v62 = vsub.f32 %v1348_v6, %v698_v61 }
 0x221   : > { %v728_v63 = vmul.f32 %v724_v60, %v724_v60 }
 0x222   : > { %v727_v0 = vmul.f32 %v723_v62, %v723_v62  ;;  %v1031_v1 = vpop.f32.mrb[2].mxu1 }
 0x223   : > { %v732_v2 = vsel %vm485_vm2, %v728_v63, 0.0  ;;  %720 = vst.msk [vmem:[%s278_s25 + $0x18] sm:$0xff] %vm485_vm2, %v1031_v1  ;;  %v726_v3 = vsub.f32 %v1356_v10, %v1031_v1  ;;  %v708_v4 = vpop.f32.mrb[3].mxu1 }
 0x224   : > { %v731_v5 = vsel %vm485_vm2, %v727_v0, 0.0  ;;  %719 = vst.msk [vmem:[%s278_s25 + $0x10] sm:$0xff] %vm485_vm2, %v708_v4  ;;  %v725_v7 = vsub.f32 %v1352_v8, %v708_v4 }
 0x225   : > { %v733_v9 = vadd.f32 %v732_v2, %v731_v5  ;;  %v730_v6 = vmul.f32 %v726_v3, %v726_v3 }
 0x226   : > { %v729_v11 = vmul.f32 %v725_v7, %v725_v7 }
 0x227   : > { %v736_v14 = vsel %vm485_vm2, %v730_v6, 0.0 }
 0x228   : > { %v734_v12 = vsel %vm485_vm2, %v729_v11, 0.0 }
 0x229   : > { %v735_v13 = vadd.f32 %v734_v12, %v733_v9 }
 0x22b   : > { %v737_v10 = vadd.f32 %v736_v14, %v735_v13 }
 0x22d   : > { %v738_v15 = vrot.slane %v737_v10, 4 }
 0x22f   : > { %v739_v16 = vadd.f32 %v738_v15, %v737_v10 }
 0x231   : > { %v740_v17 = vrot.slane %v739_v16, 2 }
 0x233   : > { %v741_v18 = vadd.f32 %v740_v17, %v739_v16 }
 0x235   : > { %v742_v19 = vrot.slane %v741_v18, 1 }
 0x237   : > { %v743_v8 = vadd.f32 %v742_v19, %v741_v18 }
 0x239   : > { %744 = vst.msk [vmem:[%s262_s9] sm:$0x1] %vm721_vm6, %v743_v8 }
 0x23a   : > { %1162 = shalt.err (!%p1159_p10)
}
 0x23b   : > { %s1163_s24 = scalar_lea.hbm %s1521_s11, 16  ;;  %s1167_s12 = scalar_lea.hbm %s1575_s5, 32 }
 0x23c   : > { %p1164_p11 = scmp.ne.s32.totalorder %s1521_s11, %s1163_s24  ;;  %p1168_p0 = scmp.lt.u32.totalorder %s1521_s11, %s1575_s5 }
 0x23d   : > { %p1169_p1 = scmp.lt.u32.totalorder %s1167_s12, %s1163_s24  ;;  %p1171_p3 = scmp.lt.u32.totalorder %s1163_s24, %s1521_s11 }
 0x23e   : > { %p1165_p12 = pnand %p1164_p11, %p1307_p4 }
 0x23f   : > { %p1170_p2 = por %p1169_p1, %p1168_p0 }
 0x240   : > { %p1166_p13 = pneg %p1165_p12 }
 0x241   : > { %p1172_p5 = por %p1171_p3, %p1170_p2 }
 0x243   : > { %p1173_p6 = pnand %p1172_p5, %p1166_p13 }
 0x245   : > { %1176 = shalt.err (!%p1173_p6)
}
 0x246   : > { %1057 = dma.vmem_to_hbm [thread:$0]  (%p1307_p4), %s1523_s14, 16, %s1521_s11, %s758_s17  }
 0x247 PF: > { %p1067_p7 = scmp.ge.s32.totalorder %s1231_s23, 2  ;;  %s811_s9 = sand.u32 1, %s1211_s18  }
 0x248   : > { %s812_s8 = scalar_lea.sflag [#allocation3], %s811_s9 }
 0x249   : > { %p1061_p9 = pnand %p1067_p7, %p1314_p8 }
 0x24b   : > { %1202 = dma.done.wait (!%p1061_p9), %s812_s8, 16  }
 0x24c   : > { %1204 = vsyncadd (!%p1061_p9), %s812_s8, 4294967280  ;;  %s820_s10 = scalar_lea.sflag [#allocation5], %s811_s9 }
 0x24d   : > { %1206 = dma.done.wait (!%p1061_p9), %s820_s10, 16  }
 0x24e   : > { %1208 = vsyncadd (!%p1061_p9), %s820_s10, 4294967280  ;;  %s22_s23 = sadd.s32 1, %s1231_s23   ;;  %s1578_s18 = smov %s1215_s19 }
 0x24f   : > { %p19_p10 = scmp.ge.s32.totalorder %s22_s23, 4   ;;  %s1579_s19 = smov %s1219_s20 }
 0x250   : > { %s1580_s20 = smov %s1320_s6  ;;  %s1581_s21 = smov %s1227_s22 }
 0x251   : > { %s1582_s22 = smov %s1584_s26  ;;  %21 = sbr.rel (!%p19_p10) target bundleno = 6 (0x6), region = 96 }
 0x258   :  { %824 = vsyncpa [#allocation3], 1 }
 0x259   :  { %826 = vsyncpa [#allocation3 + $0x1], 1 }
 0x25a   :  { %827 = vsyncpa [#allocation5], 1 }
 0x25b   :  { %829 = vsyncpa [#allocation5 + $0x1], 1 }

</bundles_post_ra>
